<compile_context>
chip_gen: v5e
topology: v5e:2x2
jax: 0.10.0
libtpu: 0.0.40
codegen_flags: <defaults>
</compile_context>

<pallas_src>
import jax
import jax.numpy as jnp
from jax.experimental import pallas as pl
from jax.experimental.pallas import tpu as pltpu


_LN_EPS = 1e-5          # PyTorch LayerNorm default
_NEG = -1e30            # effectively -inf for padded action lanes (exp -> 0 in f32)


def _round_up(x, m):
    return (x + m - 1) // m * m


def _actor_kernel(obs_ref, w1_ref, b1_ref, g_ref, beta_ref,
                  w2_ref, b2_ref, w3_ref, b3_ref, w4_ref, b4_ref,
                  probs_ref):
    cdt = w1_ref.dtype  # matmul compute dtype (f32 or bf16); accumulation is f32
    x = obs_ref[...].astype(cdt)

    # --- Linear(repr_dim -> feature_dim) ---
    h = jnp.dot(x, w1_ref[...], preferred_element_type=jnp.float32) + b1_ref[...]

    # --- LayerNorm(feature_dim): two-pass (numerically stable) variance ---
    mu = jnp.mean(h, axis=-1, keepdims=True)
    c = h - mu
    var = jnp.mean(c * c, axis=-1, keepdims=True)
    h = c * jax.lax.rsqrt(var + _LN_EPS)
    h = h * g_ref[...] + beta_ref[...]
    h = jnp.maximum(h, 0.0)                       # ReLU

    # --- Linear(feature_dim -> hidden_dim) + ReLU ---
    h = jnp.dot(h.astype(cdt), w2_ref[...],
                preferred_element_type=jnp.float32) + b2_ref[...]
    h = jnp.maximum(h, 0.0)

    # --- Linear(hidden_dim -> hidden_dim) + ReLU ---
    h = jnp.dot(h.astype(cdt), w3_ref[...],
                preferred_element_type=jnp.float32) + b3_ref[...]
    h = jnp.maximum(h, 0.0)

    # --- Linear(hidden_dim -> action_pad); padded lanes carry bias = -1e30 ---
    logits = jnp.dot(h.astype(cdt), w4_ref[...],
                     preferred_element_type=jnp.float32) + b4_ref[...]

    # --- softmax over lane-padded action dim (padded lanes exp() == 0) ---
    m = jnp.max(logits, axis=-1, keepdims=True)
    e = jnp.exp(logits - m)
    denom = jnp.sum(e, axis=-1, keepdims=True)
    probs_ref[...] = e / denom                    # exact normalization


def prepare_params(params):
    """One-time prep: lane-pad the last layer to a multiple of 128 lanes.

    Padded weight columns are 0 and padded bias lanes are -1e30, so the
    padded logits vanish under softmax.  Call this once, not per forward.
    """
    action_dim = int(params["w4"].shape[1])
    action_pad = max(_round_up(action_dim, 128), 128)
    p = dict(params)
    if action_pad != action_dim:
        p["w4"] = jnp.pad(params["w4"], ((0, 0), (0, action_pad - action_dim)))
        p["b4"] = jnp.pad(params["b4"], ((0, 0), (0, action_pad - action_dim)),
                          constant_values=_NEG)
    p["action_dim"] = action_dim
    return p


def _resident(a):
    # Constant index_map -> block never changes -> stays in VMEM, no re-DMA.
    # Single-buffered: double-buffering a never-changing block is VMEM waste.
    if hasattr(pl, "Buffered"):
        return pl.BlockSpec(a.shape, lambda i: (0,) * a.ndim,
                            pipeline_mode=pl.Buffered(1))
    return pl.BlockSpec(a.shape, lambda i: (0,) * a.ndim)


def categorical_actor_probs(obs, params, *, block_b=1024, num_batch_tiles=1):
    """Full actor MLP + softmax in one Pallas kernel.

    obs: (B, repr_dim) float32
    params: dict from init_params(), ideally run through prepare_params().
    num_batch_tiles: 1 (default) for single-TC v5e/v6e; >=2 on v7x so the
        "parallel" batch axis can be sharded across both TensorCores.
    returns: (B, action_dim) float32 probabilities of the Categorical dist.
    """
    B, repr_dim = obs.shape
    action_dim = int(params.get("action_dim", params["w4"].shape[1]))

    # Fall back to per-call padding only if prepare_params() wasn't used.
    if params["w4"].shape[1] % 128 != 0:
        params = prepare_params(params)
    w4, b4 = params["w4"], params["b4"]
    action_pad = w4.shape[1]

    # Batch tile: multiple of the sublane pack (16 for bf16 weights, else 8),
    # split into num_batch_tiles tiles, capped at block_b.
    sublane = 16 if params["w1"].dtype == jnp.bfloat16 else 8
    tiles = max(1, int(num_batch_tiles))
    tb = _round_up(max(1, -(-B // tiles)), sublane)
    tb = min(tb, _round_up(block_b, sublane))
    b_pad = _round_up(B, tb)
    obs_p = jnp.pad(obs, ((0, b_pad - B), (0, 0))) if b_pad != B else obs

    args = (obs_p,
            params["w1"], params["b1"], params["ln_gamma"], params["ln_beta"],
            params["w2"], params["b2"],
            params["w3"], params["b3"],
            w4, b4)

    in_specs = [pl.BlockSpec((tb, repr_dim), lambda i: (i, 0))] + \
               [_resident(a) for a in args[1:]]
    out_specs = pl.BlockSpec((tb, action_pad), lambda i: (i, 0))

    feature_dim = params["w1"].shape[1]
    hidden_dim = params["w3"].shape[1]
    flops = 2 * b_pad * (repr_dim * feature_dim + feature_dim * hidden_dim
                         + hidden_dim * hidden_dim + hidden_dim * action_pad)
    bytes_accessed = (obs_p.size * obs_p.dtype.itemsize
                      + sum(a.size * a.dtype.itemsize for a in args[1:])
                      + b_pad * action_pad * 4)
    cost = pl.CostEstimate(flops=flops,
                           transcendentals=b_pad * (action_pad + 1),
                           bytes_accessed=bytes_accessed)

    probs_p = pl.pallas_call(
        _actor_kernel,
        out_shape=jax.ShapeDtypeStruct((b_pad, action_pad), jnp.float32),
        grid=(b_pad // tb,),
        in_specs=in_specs,
        out_specs=out_specs,
        compiler_params=pltpu.CompilerParams(
            dimension_semantics=("parallel",)),
        cost_estimate=cost,
    )(*args)

    return probs_p[:B, :action_dim]


def init_params(key, repr_dim, feature_dim, hidden_dim, action_dim):
    # Deterministic synthetic init (utils.weight_init uses orthogonal init;
    # here scaled normal weights + zero biases — shapes/semantics match).
    # Weights stored as (in_features, out_features) == PyTorch W.T.
    ks = jax.random.split(key, 4)

    def lin(k, fan_in, fan_out):
        w = jax.random.normal(k, (fan_in, fan_out), jnp.float32) / jnp.sqrt(fan_in)
        b = jnp.zeros((1, fan_out), jnp.float32)
        return w, b

    w1, b1 = lin(ks[0], repr_dim, feature_dim)
    w2, b2 = lin(ks[1], feature_dim, hidden_dim)
    w3, b3 = lin(ks[2], hidden_dim, hidden_dim)
    w4, b4 = lin(ks[3], hidden_dim, action_dim)
    return {
        "w1": w1, "b1": b1,
        "ln_gamma": jnp.ones((1, feature_dim), jnp.float32),
        "ln_beta": jnp.zeros((1, feature_dim), jnp.float32),
        "w2": w2, "b2": b2,
        "w3": w3, "b3": b3,
        "w4": w4, "b4": b4,
    }


def _reference(obs, p, action_dim):
    h = obs @ p["w1"].astype(jnp.float32) + p["b1"]
    mu = h.mean(-1, keepdims=True)
    var = ((h - mu) ** 2).mean(-1, keepdims=True)
    h = (h - mu) / jnp.sqrt(var + _LN_EPS) * p["ln_gamma"] + p["ln_beta"]
    h = jnp.maximum(h, 0.0)
    h = jnp.maximum(h @ p["w2"].astype(jnp.float32) + p["b2"], 0.0)
    h = jnp.maximum(h @ p["w3"].astype(jnp.float32) + p["b3"], 0.0)
    logits = (h @ p["w4"][:, :action_dim].astype(jnp.float32)
              + p["b4"][:, :action_dim])
    return jax.nn.softmax(logits, axis=-1)


if __name__ == "__main__":
    # Small, lane-friendly shapes consistent with the module's constructor.
    B, repr_dim, feature_dim, hidden_dim, action_dim = 64, 32, 128, 128, 4

    key = jax.random.PRNGKey(0)
    k_obs, k_par = jax.random.split(key)
    obs = jax.random.normal(k_obs, (B, repr_dim), jnp.float32)
    params = prepare_params(
        init_params(k_par, repr_dim, feature_dim, hidden_dim, action_dim))
    ref = _reference(obs, params, action_dim)

    # f32 path, 2 batch tiles (exercises the batch pipeline; v7x-friendly split).
    probs = jax.block_until_ready(
        categorical_actor_probs(obs, params, num_batch_tiles=2))
    assert probs.shape == (B, action_dim)
    assert jnp.allclose(probs, ref, atol=2e-3, rtol=2e-3), "f32 mismatch vs reference"
    assert jnp.allclose(probs.sum(-1), 1.0, atol=1e-5), "f32 probs do not sum to 1"

    # bf16-weight path (v6e/v7x MXU-friendly), f32 accumulation retained,
    # single fat batch tile (v5e/v6e policy).
    params_bf16 = dict(params)
    for name in ("w1", "w2", "w3", "w4"):
        params_bf16[name] = params[name].astype(jnp.bfloat16)
    probs_bf16 = jax.block_until_ready(
        categorical_actor_probs(obs, params_bf16, num_batch_tiles=1))
    assert jnp.allclose(probs_bf16, ref, atol=5e-2), "bf16 mismatch vs reference"
    assert jnp.allclose(probs_bf16.sum(-1), 1.0, atol=1e-4), "bf16 probs do not sum to 1"

    # TODO(synk): torch.distributions.Categorical (sampling/log_prob) is a
    # distribution object, not a tensor op; the kernel returns its `probs`.
    print("KERNEL_OK")
</pallas_src>

<mosaic_0001>
module attributes {stable_mosaic.version = 11 : i64} {
  func.func @_actor_kernel(%arg0: i32, %arg1: memref<32x32xf32, #tpu.memory_space<vmem>>, %arg2: memref<32x128xf32, #tpu.memory_space<vmem>>, %arg3: memref<1x128xf32, #tpu.memory_space<vmem>>, %arg4: memref<1x128xf32, #tpu.memory_space<vmem>>, %arg5: memref<1x128xf32, #tpu.memory_space<vmem>>, %arg6: memref<128x128xf32, #tpu.memory_space<vmem>>, %arg7: memref<1x128xf32, #tpu.memory_space<vmem>>, %arg8: memref<128x128xf32, #tpu.memory_space<vmem>>, %arg9: memref<1x128xf32, #tpu.memory_space<vmem>>, %arg10: memref<128x128xf32, #tpu.memory_space<vmem>>, %arg11: memref<1x128xf32, #tpu.memory_space<vmem>>, %arg12: memref<32x128xf32, #tpu.memory_space<vmem>>) attributes {dimension_semantics = [#tpu.dimension_semantics<parallel>], iteration_bounds = array<i64: 2>, scalar_prefetch = 0 : i64, scratch_operands = 0 : i64, tpu.core_type = #tpu.core_type<tc>, window_params = [{transform_indices = @transform_0, window_bounds = array<i64: 32, 32>}, {pipeline_mode = #tpu.pipeline_mode<synchronous>, transform_indices = @transform_1, window_bounds = array<i64: 32, 128>}, {pipeline_mode = #tpu.pipeline_mode<synchronous>, transform_indices = @transform_2, window_bounds = array<i64: 1, 128>}, {pipeline_mode = #tpu.pipeline_mode<synchronous>, transform_indices = @transform_3, window_bounds = array<i64: 1, 128>}, {pipeline_mode = #tpu.pipeline_mode<synchronous>, transform_indices = @transform_4, window_bounds = array<i64: 1, 128>}, {pipeline_mode = #tpu.pipeline_mode<synchronous>, transform_indices = @transform_5, window_bounds = array<i64: 128, 128>}, {pipeline_mode = #tpu.pipeline_mode<synchronous>, transform_indices = @transform_6, window_bounds = array<i64: 1, 128>}, {pipeline_mode = #tpu.pipeline_mode<synchronous>, transform_indices = @transform_7, window_bounds = array<i64: 128, 128>}, {pipeline_mode = #tpu.pipeline_mode<synchronous>, transform_indices = @transform_8, window_bounds = array<i64: 1, 128>}, {pipeline_mode = #tpu.pipeline_mode<synchronous>, transform_indices = @transform_9, window_bounds = array<i64: 128, 128>}, {pipeline_mode = #tpu.pipeline_mode<synchronous>, transform_indices = @transform_10, window_bounds = array<i64: 1, 128>}, {transform_indices = @transform_11, window_bounds = array<i64: 32, 128>}]} {
    %c0 = arith.constant 0 : index
    %c0_0 = arith.constant 0 : index
    %0 = vector.load %arg1[%c0, %c0_0] : memref<32x32xf32, #tpu.memory_space<vmem>>, vector<32x32xf32>
    %c0_1 = arith.constant 0 : index
    %c0_2 = arith.constant 0 : index
    %1 = vector.load %arg2[%c0_1, %c0_2] : memref<32x128xf32, #tpu.memory_space<vmem>>, vector<32x128xf32>
    %cst = arith.constant dense<0.000000e+00> : vector<32x128xf32>
    %2 = tpu.matmul %0, %1, %cst {dimension_numbers = #tpu.dot_dimension_numbers<[1], [0], [0], [1], [0, 0, 1, 1], [], []>} : vector<32x32xf32>, vector<32x128xf32>, vector<32x128xf32> -> vector<32x128xf32>
    %c0_3 = arith.constant 0 : index
    %c0_4 = arith.constant 0 : index
    %3 = vector.load %arg3[%c0_3, %c0_4] : memref<1x128xf32, #tpu.memory_space<vmem>>, vector<1x128xf32>
    %4 = vector.broadcast %3 : vector<1x128xf32> to vector<32x128xf32>
    %5 = arith.addf %2, %4 : vector<32x128xf32>
    %cst_5 = arith.constant dense<0.000000e+00> : vector<32xf32>
    %6 = vector.multi_reduction <add>, %5, %cst_5 [1] : vector<32x128xf32> to vector<32xf32>
    %7 = vector.shape_cast %6 : vector<32xf32> to vector<32x1xf32>
    %cst_6 = arith.constant 1.280000e+02 : f32
    %8 = vector.broadcast %cst_6 : f32 to vector<32x1xf32>
    %9 = arith.divf %7, %8 : vector<32x1xf32>
    %10 = vector.broadcast %9 : vector<32x1xf32> to vector<32x128xf32>
    %11 = arith.subf %5, %10 : vector<32x128xf32>
    %12 = arith.mulf %11, %11 : vector<32x128xf32>
    %cst_7 = arith.constant dense<0.000000e+00> : vector<32xf32>
    %13 = vector.multi_reduction <add>, %12, %cst_7 [1] : vector<32x128xf32> to vector<32xf32>
    %14 = vector.shape_cast %13 : vector<32xf32> to vector<32x1xf32>
    %cst_8 = arith.constant 1.280000e+02 : f32
    %15 = vector.broadcast %cst_8 : f32 to vector<32x1xf32>
    %16 = arith.divf %14, %15 : vector<32x1xf32>
    %cst_9 = arith.constant 9.99999974E-6 : f32
    %17 = vector.broadcast %cst_9 : f32 to vector<32x1xf32>
    %18 = arith.addf %16, %17 : vector<32x1xf32>
    %19 = math.rsqrt %18 : vector<32x1xf32>
    %20 = vector.broadcast %19 : vector<32x1xf32> to vector<32x128xf32>
    %21 = arith.mulf %11, %20 : vector<32x128xf32>
    %c0_10 = arith.constant 0 : index
    %c0_11 = arith.constant 0 : index
    %22 = vector.load %arg4[%c0_10, %c0_11] : memref<1x128xf32, #tpu.memory_space<vmem>>, vector<1x128xf32>
    %23 = vector.broadcast %22 : vector<1x128xf32> to vector<32x128xf32>
    %24 = arith.mulf %21, %23 : vector<32x128xf32>
    %c0_12 = arith.constant 0 : index
    %c0_13 = arith.constant 0 : index
    %25 = vector.load %arg5[%c0_12, %c0_13] : memref<1x128xf32, #tpu.memory_space<vmem>>, vector<1x128xf32>
    %26 = vector.broadcast %25 : vector<1x128xf32> to vector<32x128xf32>
    %27 = arith.addf %24, %26 : vector<32x128xf32>
    %cst_14 = arith.constant 0.000000e+00 : f32
    %28 = vector.broadcast %cst_14 : f32 to vector<32x128xf32>
    %29 = arith.maximumf %27, %28 : vector<32x128xf32>
    %c0_15 = arith.constant 0 : index
    %c0_16 = arith.constant 0 : index
    %30 = vector.load %arg6[%c0_15, %c0_16] : memref<128x128xf32, #tpu.memory_space<vmem>>, vector<128x128xf32>
    %cst_17 = arith.constant dense<0.000000e+00> : vector<32x128xf32>
    %31 = tpu.matmul %29, %30, %cst_17 {dimension_numbers = #tpu.dot_dimension_numbers<[1], [0], [0], [1], [0, 0, 1, 1], [], []>} : vector<32x128xf32>, vector<128x128xf32>, vector<32x128xf32> -> vector<32x128xf32>
    %c0_18 = arith.constant 0 : index
    %c0_19 = arith.constant 0 : index
    %32 = vector.load %arg7[%c0_18, %c0_19] : memref<1x128xf32, #tpu.memory_space<vmem>>, vector<1x128xf32>
    %33 = vector.broadcast %32 : vector<1x128xf32> to vector<32x128xf32>
    %34 = arith.addf %31, %33 : vector<32x128xf32>
    %cst_20 = arith.constant 0.000000e+00 : f32
    %35 = vector.broadcast %cst_20 : f32 to vector<32x128xf32>
    %36 = arith.maximumf %34, %35 : vector<32x128xf32>
    %c0_21 = arith.constant 0 : index
    %c0_22 = arith.constant 0 : index
    %37 = vector.load %arg8[%c0_21, %c0_22] : memref<128x128xf32, #tpu.memory_space<vmem>>, vector<128x128xf32>
    %cst_23 = arith.constant dense<0.000000e+00> : vector<32x128xf32>
    %38 = tpu.matmul %36, %37, %cst_23 {dimension_numbers = #tpu.dot_dimension_numbers<[1], [0], [0], [1], [0, 0, 1, 1], [], []>} : vector<32x128xf32>, vector<128x128xf32>, vector<32x128xf32> -> vector<32x128xf32>
    %c0_24 = arith.constant 0 : index
    %c0_25 = arith.constant 0 : index
    %39 = vector.load %arg9[%c0_24, %c0_25] : memref<1x128xf32, #tpu.memory_space<vmem>>, vector<1x128xf32>
    %40 = vector.broadcast %39 : vector<1x128xf32> to vector<32x128xf32>
    %41 = arith.addf %38, %40 : vector<32x128xf32>
    %cst_26 = arith.constant 0.000000e+00 : f32
    %42 = vector.broadcast %cst_26 : f32 to vector<32x128xf32>
    %43 = arith.maximumf %41, %42 : vector<32x128xf32>
    %c0_27 = arith.constant 0 : index
    %c0_28 = arith.constant 0 : index
    %44 = vector.load %arg10[%c0_27, %c0_28] : memref<128x128xf32, #tpu.memory_space<vmem>>, vector<128x128xf32>
    %cst_29 = arith.constant dense<0.000000e+00> : vector<32x128xf32>
    %45 = tpu.matmul %43, %44, %cst_29 {dimension_numbers = #tpu.dot_dimension_numbers<[1], [0], [0], [1], [0, 0, 1, 1], [], []>} : vector<32x128xf32>, vector<128x128xf32>, vector<32x128xf32> -> vector<32x128xf32>
    %c0_30 = arith.constant 0 : index
    %c0_31 = arith.constant 0 : index
    %46 = vector.load %arg11[%c0_30, %c0_31] : memref<1x128xf32, #tpu.memory_space<vmem>>, vector<1x128xf32>
    %47 = vector.broadcast %46 : vector<1x128xf32> to vector<32x128xf32>
    %48 = arith.addf %45, %47 : vector<32x128xf32>
    %cst_32 = arith.constant dense<0xFF800000> : vector<32xf32>
    %49 = vector.multi_reduction <maximumf>, %48, %cst_32 [1] : vector<32x128xf32> to vector<32xf32>
    %50 = vector.shape_cast %49 : vector<32xf32> to vector<32x1xf32>
    %51 = vector.broadcast %50 : vector<32x1xf32> to vector<32x128xf32>
    %52 = arith.subf %48, %51 : vector<32x128xf32>
    %53 = math.exp %52 : vector<32x128xf32>
    %cst_33 = arith.constant dense<0.000000e+00> : vector<32xf32>
    %54 = vector.multi_reduction <add>, %53, %cst_33 [1] : vector<32x128xf32> to vector<32xf32>
    %55 = vector.shape_cast %54 : vector<32xf32> to vector<32x1xf32>
    %56 = vector.broadcast %55 : vector<32x1xf32> to vector<32x128xf32>
    %57 = arith.divf %53, %56 : vector<32x128xf32>
    %c0_34 = arith.constant 0 : index
    %c0_35 = arith.constant 0 : index
    %58 = vector.load %arg12[%c0_34, %c0_35] : memref<32x128xf32, #tpu.memory_space<vmem>>, vector<32x128xf32>
    tpu.vector_store %arg12[%c0_34, %c0_35], %57 {strides = array<i32>} : memref<32x128xf32, #tpu.memory_space<vmem>>, vector<32x128xf32>,
    return
  }
  func.func @transform_0(%arg0: i32) -> (i32, i32) {
    %c0_i32 = arith.constant 0 : i32
    %c0_i32_0 = arith.constant 0 : i32
    return %arg0, %c0_i32 : i32, i32
  }
  func.func @transform_1(%arg0: i32) -> (i32, i32) {
    %c0_i32 = arith.constant 0 : i32
    %c0_i32_0 = arith.constant 0 : i32
    %c0_i32_1 = arith.constant 0 : i32
    return %c0_i32, %c0_i32_0 : i32, i32
  }
  func.func @transform_2(%arg0: i32) -> (i32, i32) {
    %c0_i32 = arith.constant 0 : i32
    %c0_i32_0 = arith.constant 0 : i32
    %c0_i32_1 = arith.constant 0 : i32
    return %c0_i32, %c0_i32_0 : i32, i32
  }
  func.func @transform_3(%arg0: i32) -> (i32, i32) {
    %c0_i32 = arith.constant 0 : i32
    %c0_i32_0 = arith.constant 0 : i32
    %c0_i32_1 = arith.constant 0 : i32
    return %c0_i32, %c0_i32_0 : i32, i32
  }
  func.func @transform_4(%arg0: i32) -> (i32, i32) {
    %c0_i32 = arith.constant 0 : i32
    %c0_i32_0 = arith.constant 0 : i32
    %c0_i32_1 = arith.constant 0 : i32
    return %c0_i32, %c0_i32_0 : i32, i32
  }
  func.func @transform_5(%arg0: i32) -> (i32, i32) {
    %c0_i32 = arith.constant 0 : i32
    %c0_i32_0 = arith.constant 0 : i32
    %c0_i32_1 = arith.constant 0 : i32
    return %c0_i32, %c0_i32_0 : i32, i32
  }
  func.func @transform_6(%arg0: i32) -> (i32, i32) {
    %c0_i32 = arith.constant 0 : i32
    %c0_i32_0 = arith.constant 0 : i32
    %c0_i32_1 = arith.constant 0 : i32
    return %c0_i32, %c0_i32_0 : i32, i32
  }
  func.func @transform_7(%arg0: i32) -> (i32, i32) {
    %c0_i32 = arith.constant 0 : i32
    %c0_i32_0 = arith.constant 0 : i32
    %c0_i32_1 = arith.constant 0 : i32
    return %c0_i32, %c0_i32_0 : i32, i32
  }
  func.func @transform_8(%arg0: i32) -> (i32, i32) {
    %c0_i32 = arith.constant 0 : i32
    %c0_i32_0 = arith.constant 0 : i32
    %c0_i32_1 = arith.constant 0 : i32
    return %c0_i32, %c0_i32_0 : i32, i32
  }
  func.func @transform_9(%arg0: i32) -> (i32, i32) {
    %c0_i32 = arith.constant 0 : i32
    %c0_i32_0 = arith.constant 0 : i32
    %c0_i32_1 = arith.constant 0 : i32
    return %c0_i32, %c0_i32_0 : i32, i32
  }
  func.func @transform_10(%arg0: i32) -> (i32, i32) {
    %c0_i32 = arith.constant 0 : i32
    %c0_i32_0 = arith.constant 0 : i32
    %c0_i32_1 = arith.constant 0 : i32
    return %c0_i32, %c0_i32_0 : i32, i32
  }
  func.func @transform_11(%arg0: i32) -> (i32, i32) {
    %c0_i32 = arith.constant 0 : i32
    %c0_i32_0 = arith.constant 0 : i32
    return %arg0, %c0_i32 : i32, i32
  }
}

</mosaic_0001>

<bundles_post_ra>
// kernel: tpu_custom_call.1
= control target key start
LH: loop header
LB: loop body
LE: loop exit
PB: predicated region body
PF: predicated region fallthrough
CT: control target
= control target key end

     0   :  { %s1528_s0 = inlined_call_operand.vmem [shape: f32[64,32], index: 0, kind: input, shape index: {}]   ;;  %s1529_s1 = inlined_call_operand.vmem [shape: f32[32,128], index: 1, kind: input, shape index: {}]   ;;  %s1530_s2 = inlined_call_operand.vmem [shape: f32[1,128], index: 2, kind: input, shape index: {}]   ;;  %s1531_s3 = inlined_call_operand.vmem [shape: f32[1,128], index: 3, kind: input, shape index: {}]   ;;  %s1532_s4 = inlined_call_operand.vmem [shape: f32[1,128], index: 4, kind: input, shape index: {}]   ;;  %s1533_s5 = inlined_call_operand.hbm [shape: f32[128,128], index: 5, kind: input, shape index: {}]   ;;  %s1534_s6 = inlined_call_operand.vmem [shape: f32[1,128], index: 6, kind: input, shape index: {}]   ;;  %s1535_s7 = inlined_call_operand.hbm [shape: f32[128,128], index: 7, kind: input, shape index: {}]   ;;  %s1536_s8 = inlined_call_operand.vmem [shape: f32[1,128], index: 8, kind: input, shape index: {}]   ;;  %s1537_s9 = inlined_call_operand.hbm [shape: f32[128,128], index: 9, kind: input, shape index: {}]   ;;  %s1538_s10 = inlined_call_operand.vmem [shape: f32[1,128], index: 10, kind: input, shape index: {}]   ;;  %s1539_s11 = inlined_call_operand.hbm [shape: f32[64,128], index: 11, kind: output, shape index: {}]  }
   0x1   :  { %1543 = sst [smem:[#allocation15_spill]] %s1533_s5 }
   0x2   :  { %1544 = sst [smem:[#allocation16_spill]] %s1535_s7 }
   0x3   :  { %16 = vsyncpa [#allocation3], 0 }
   0x4   :  { %17 = vsyncpa [#allocation6], 0 }
   0x5   :  { %18 = vsyncpa [#allocation4], 0 }
   0x6   :  { %20 = vsyncpa [#allocation4 + $0x1], 0  ;;  %s1315_s17 = smov 0   ;;  %s1317_s18 = smov 0  }
   0x7   :  { %s1319_s19 = smov 0   ;;  %s1321_s20 = smov 0  }
   0x8 LB: > { %1545 = sst [smem:[#allocation12_spill]] %s1241_s19  ;;  %s1336_s21 = sadd.s32 4294967295, %s1245_s20   ;;  %s1245_s20 = sphi %s1321_s20, %s1554_s20   ;;  %s1241_s19 = sphi %s1319_s19, %s1556_s19   ;;  %s1237_s18 = sphi %s1317_s18, %s1558_s18   ;;  %s1233_s17 = sphi %s1315_s17, %s1557_s17  }
   0x9   : > { %s955_s22 = sadd.s32 4294967294, %s1245_s20   ;;  %s1340_s23 = sadd.s32 1, %s1245_s20  }
   0xa   : > { %1546 = sst [smem:[#allocation13_spill]] %s1340_s23  ;;  %s269_s24 = sadd.s32 1, %s1241_s19 }
   0xb   : > { %s266_s25 = ssub.s32 %s1245_s20, %s1340_s23  ;;  %p279_p0 = scmp.ne.s32.totalorder %s1241_s19, %s1237_s18 }
   0xc   : > { %p267_p1 = scmp.eq.s32.totalorder %s266_s25, 0  ;;  %p280_p2 = scmp.eq.s32.totalorder %s1336_s21, 1 }
   0xd   : > { %p285_p3 = scmp.ne.s32.totalorder %s1237_s18, %s1233_s17  ;;  %p286_p4 = scmp.eq.s32.totalorder %s955_s22, 1 }
   0xe   : > { %s1351_s26 = scalar_select %p267_p1, %s1241_s19, %s269_s24  }
   0xf   : > { %p1353_p5 = por %p280_p2, %p279_p0  ;;  %p1357_p6 = por %p286_p4, %p285_p3 }
  0x10   : > { %1547 = sst [smem:[#allocation14_spill]] %s1351_s26  ;;  %p956_p7 = scmp.ge.s32.totalorder %s1245_s20, 1 }
  0x11   : > { %p293_p8 = scmp.lt.s32.totalorder %s1245_s20, 3  ;;  %p1006_p9 = scmp.eq.s32.totalorder %s1336_s21, 0 }
  0x12   : > { %s1551_s7 = sld [smem:[#allocation16_spill]]  ;;  %s1247_s24 = smov [#allocation5]  }
  0x13   : > { %p1364_p10 = pnand %p956_p7, %p293_p8  ;;  %s1552_s5 = sld [smem:[#allocation15_spill]] }
  0x14   : > { %s335_s25 = sshll.u32 %s1247_s24, 4  ;;  %s1248_s30 = smov 128   ;;  %s336_s25 = int_to_ptr.vmem [resolvable:$true] %s335_s25 }
  0x15   : > { %p992_p11 = pneg %p1364_p10  ;;  %s1249_s12 = smov 8  }
  0x16   : > { %s1251_s19 = smov [#allocation7]  }
  0x17   : > { %p1378_p12 = pnand %p1006_p9, %p992_p11  ;;  %s352_s23 = sshll.u32 %s1251_s19, 4  ;;  %s353_s23 = int_to_ptr.vmem [resolvable:$true] %s352_s23 }
  0x18   : > { %s333_s13 = sshll.u32 %s1551_s7, 4  ;;  %s1250_s7 = smov [#allocation2]   ;;  %s334_s13 = int_to_ptr.hbm [resolvable:$true] %s333_s13 }
  0x19   : > { %s316_s16 = sshll.u32 %s1552_s5, 4  ;;  %s318_s26 = sshll.u32 %s1250_s7, 4  ;;  %s317_s16 = int_to_ptr.hbm [resolvable:$true] %s316_s16  ;;  %s319_s26 = int_to_ptr.vmem [resolvable:$true] %s318_s26 }
  0x1a   : > { %998 = dma.hbm_to_vmem [thread:$0]  (!%p1378_p12), %s334_s13, 2048, %s336_s25, [#allocation6], %s1248_s30, %s1248_s30, %s1249_s12  }
  0x1b   : > { %s350_s5 = sshll.u32 %s1537_s9, 4  ;;  %380 = sbr.rel (%p1364_p10) target bundleno = 1129 (0x469), region = 64  ;;  %s351_s5 = int_to_ptr.hbm [resolvable:$true] %s350_s5 }
  0x1c   : > { %995 = dma.hbm_to_vmem [thread:$0]  (!%p1378_p12), %s317_s16, 2048, %s319_s26, [#allocation3], %s1248_s30, %s1248_s30, %s1249_s12  }
  0x1d   : > { %1001 = dma.hbm_to_vmem [thread:$0]  (!%p1378_p12), %s351_s5, 2048, %s353_s23, [#allocation6], %s1248_s30, %s1248_s30, %s1249_s12  }
  0x20   : > { %1220 = dma.done.wait (%p1006_p9), [#allocation3], 2048  }
  0x21   : > { %1222 = vsyncadd (%p1006_p9), [#allocation3], 4294965248 }
  0x22   : > { %1224 = dma.done.wait (%p1006_p9), [#allocation6], 4096  }
  0x23   : > { %1226 = vsyncadd (%p1006_p9), [#allocation6], 4294963200  ;;  %s966_s7 = sshll.u32 %s1336_s21, 2  ;;  %v445_v0 = vld [vmem:[%s1529_s1 + $0x18] sm:$0xff]  ;;  %v444_v1 = vld [vmem:[%s1529_s1 + $0x10] sm:$0xff]  ;;  %vm450_vm0 = vcmask 261120  }
  0x24   : > { %p432_p13 = scmp.lt.s32.totalorder %s966_s7, 7  ;;  %475 = vmatpush.msra.mxu0 %v445_v0  ;;  %v443_v2 = vld [vmem:[%s1529_s1 + $0x8] sm:$0xff]  ;;  %v442_v3 = vld [vmem:[%s1529_s1] sm:$0xff]  ;;  %v1252_v17 = vmov 128.0   ;;  %v614_v24 = vld [vmem:[#allocation2 + $0x78] sm:$0xff]  ;;  %s977_s14 = sshll.u32 %s1336_s21, 5 }
  0x25   : > { %v1053_v8 = vld [vmem:[%s1530_s2] ss:$0 sm:$0xff]  ;;  %1059 = vrcp.f32 %v1252_v17  ;;  %619 = vmatpush.msra.mxu1 %v614_v24  ;;  %v613_v41 = vld [vmem:[#allocation2 + $0x70] sm:$0xff]  ;;  %v612_v42 = vld [vmem:[#allocation2 + $0x68] sm:$0xff]  ;;  %s1195_s22 = scalar_lea.hbm %s1539_s11, 64 }
  0x26   : > { %s1560_s7 = smov (!%p432_p13, %s966_s7), 7  ;;  %476 = vmatpush.msra.mxu0 %v444_v1  ;;  %v611_v43 = vld [vmem:[#allocation2 + $0x60] sm:$0xff]  ;;  %v610_v44 = vld [vmem:[#allocation2 + $0x58] sm:$0xff]  ;;  %v609_v45 = vld [vmem:[#allocation2 + $0x50] sm:$0xff] }
  0x27   : > { %s967_s5 = sshll.u32 %s1560_s7, 3  ;;  %620 = vmatpush.msra.mxu1 %v613_v41  ;;  %v608_v46 = vld [vmem:[#allocation2 + $0x48] sm:$0xff]  ;;  %v607_v47 = vld [vmem:[#allocation2 + $0x40] sm:$0xff]  ;;  %v606_v48 = vld [vmem:[#allocation2 + $0x38] sm:$0xff] }
  0x28   : > { %s435_s25 = scalar_lea.vmem %s1528_s0, %s967_s5  ;;  %477 = vmatpush.msra.mxu0 %v443_v2  ;;  %v605_v49 = vld [vmem:[#allocation2 + $0x30] sm:$0xff]  ;;  %v604_v50 = vld [vmem:[#allocation2 + $0x28] sm:$0xff]  ;;  %v603_v51 = vld [vmem:[#allocation2 + $0x20] sm:$0xff]  ;;  %s858_s5 = scalar_lea.hbm %s1539_s11, %s977_s14 }
  0x29   : > { %v438_v4 = vld [vmem:[%s435_s25] sm:$0xff]  ;;  %v439_v5 = vld [vmem:[%s435_s25 + $0x8] sm:$0xff]  ;;  %v440_v6 = vld [vmem:[%s435_s25 + $0x10] sm:$0xff]  ;;  %621 = vmatpush.msra.mxu1 %v612_v42  ;;  %s861_s21 = sshll.u32 %s858_s5, 4  ;;  %s862_s21 = int_to_ptr.hbm [resolvable:$true] %s861_s21 }
  0x2a   : > { %478 = vmatpush.msra.mxu0 %v442_v3  ;;  %v441_v7 = vld [vmem:[%s435_s25 + $0x18] sm:$0xff]  ;;  %v601_v53 = vld [vmem:[#allocation2 + $0x10] sm:$0xff]  ;;  %v600_v54 = vld [vmem:[#allocation2 + $0x8] sm:$0xff]  ;;  %s428_s25 = sand.u32 1, %s1237_s18   ;;  %s1189_s26 = sshra.s32 %s862_s21, 4  ;;  %s1190_s26 = int_to_ptr.hbm [resolvable:$true] %s1189_s26 }
  0x2b   : > { %968 = vmatmul.msk.f32.vlgmr.msra.gmra.mxu0 %vm450_vm0, %v438_v4  ;;  %v1060_v18 = vpop.eup %1059  ;;  %622 = vmatpush.msra.mxu1 %v611_v43  ;;  %v602_v52 = vld [vmem:[#allocation2 + $0x18] sm:$0xff]  ;;  %v599_v55 = vld [vmem:[#allocation2] sm:$0xff]  ;;  %s965_s30 = sshll.u32 %s428_s25, 5  ;;  %s847_s23 = scalar_lea.sflag [#allocation4], %s428_s25 }
  0x2c   : > { %v501_v19 = vmul.f32 128.0, %v1060_v18  ;;  %vm505_vm1 = vweird.f32 %v1060_v18  ;;  %v660_v43 = vld [vmem:[#allocation5 + $0x40] sm:$0xff]  ;;  %s1486_s12 = scalar_lea.vmem [#allocation8], %s965_s30  ;;  %s1191_s29 = scalar_lea.hbm %s1190_s26, 32 }
  0x2d   : > { %623 = vmatpush.msra.mxu1 %v610_v44  ;;  %s859_s19 = sshll.u32 %s1486_s12, 4  ;;  %p1192_p0 = scmp.ne.s32.totalorder %s1190_s26, %s1191_s29  ;;  %s860_s19 = int_to_ptr.vmem [resolvable:$true] %s859_s19 }
  0x2e   : > { %v502_v20 = vsub.f32 1.0, %v501_v19  ;;  %p1196_p3 = scmp.lt.s32.totalorder %s1190_s26, %s1539_s11  ;;  %p1197_p4 = scmp.lt.s32.totalorder %s1195_s22, %s1191_s29 }
  0x2f   : > { %624 = vmatpush.msra.mxu1 %v609_v45  ;;  %p1193_p1 = pnand %p1192_p0, %p1353_p5 }
  0x30   : > { %v503_v21 = vmul.f32 %v1060_v18, %v502_v20  ;;  %v665_v20 = vld [vmem:[#allocation5 + $0x68] sm:$0xff]  ;;  %p1198_p7 = por %p1197_p4, %p1196_p3 }
  0x31   : > { %625 = vmatpush.msra.mxu1 %v608_v46  ;;  %p1194_p2 = pneg %p1193_p1 }
  0x32   : > { %v504_v22 = vadd.f32 %v1060_v18, %v503_v21 }
  0x33   : > { %969 = vmatmul.msk.f32.gmra.mxu0 %vm450_vm0, %v439_v5  ;;  %626 = vmatpush.msra.mxu1 %v607_v47  ;;  %p1199_p8 = pnand %p1198_p7, %p1194_p2 }
  0x34   : > { %v1420_v23 = vsel %vm505_vm1, %v1060_v18, %v504_v22 }
  0x35   : > { %627 = vmatpush.msra.mxu1 %v606_v48 }
  0x37   : > { %628 = vmatpush.msra.mxu1 %v605_v49 }
  0x39   : > { %629 = vmatpush.msra.mxu1 %v604_v50  ;;  %v658_v50 = vld [vmem:[#allocation5 + $0x30] sm:$0xff] }
  0x3b   : > { %970 = vmatmul.msk.f32.gmra.mxu0 %vm450_vm0, %v440_v6  ;;  %630 = vmatpush.msra.mxu1 %v603_v51 }
  0x3d   : > { %631 = vmatpush.msra.mxu1 %v602_v52 }
  0x3f   : > { %632 = vmatpush.msra.mxu1 %v601_v53  ;;  %v657_v53 = vld [vmem:[#allocation5 + $0x28] sm:$0xff] }
  0x41   : > { %633 = vmatpush.msra.mxu1 %v600_v54 }
  0x43   : > { %971 = vmatmul.msk.f32.gmra.mxu0 %vm450_vm0, %v441_v7  ;;  %634 = vmatpush.msra.mxu1 %v599_v55 }
  0xa8   : > { %v480_v9 = vpop.f32.mrf.mxu0 }
  0xa9   : > { %v481_v10 = vadd.f32 %v1053_v8, %v480_v9  ;;  %v1448_v9 = vld [vmem:[%s1531_s3] ss:$0 sm:$0xff] }
  0xab   : > { %492 = vadd.xlane.f32.xlu0 %v481_v10 }
  0xb0   : > { %v483_v11 = vpop.f32.mrf.mxu0 }
  0xb1   : > { %v484_v12 = vadd.f32 %v1053_v8, %v483_v11 }
  0xb3   : > { %494 = vadd.xlane.f32.xlu0 %v484_v12 }
  0xb8   : > { %v486_v13 = vpop.f32.mrf.mxu0 }
  0xb9   : > { %v487_v14 = vadd.f32 %v1053_v8, %v486_v13  ;;  %v1454_v13 = vld [vmem:[%s1532_s4] ss:$0 sm:$0xff] }
  0xbb   : > { %496 = vadd.xlane.f32.xlu1 %v487_v14 }
  0xc0   : > { %v489_v15 = vpop.f32.mrf.mxu0 }
  0xc1   : > { %v490_v16 = vadd.f32 %v1053_v8, %v489_v15  ;;  %v666_v15 = vld [vmem:[#allocation5 + $0x70] sm:$0xff] }
  0xc3   : > { %498 = vadd.xlane.f32.xlu1 %v490_v16 }
 0x11e   : > { %v493_v25 = vpop.xlane.xlu0 %492 }
 0x11f   : > { %v507_v26 = vmul.f32 %v1420_v23, %v493_v25 }
 0x121   : > { %v1423_v27 = vsub.f32 %v481_v10, %v507_v26  ;;  %v664_v26 = vld [vmem:[#allocation5 + $0x60] sm:$0xff] }
 0x123   : > { %v515_v28 = vmul.f32 %v1423_v27, %v1423_v27 }
 0x125   : > { %519 = vadd.xlane.f32.xlu2 %v515_v28 }
 0x126   : > { %v495_v29 = vpop.xlane.xlu0 %494 }
 0x127   : > { %v508_v30 = vmul.f32 %v1420_v23, %v495_v29 }
 0x129   : > { %v1428_v31 = vsub.f32 %v484_v12, %v508_v30  ;;  %v663_v30 = vld [vmem:[#allocation5 + $0x58] sm:$0xff] }
 0x12b   : > { %v516_v32 = vmul.f32 %v1428_v31, %v1428_v31 }
 0x12d   : > { %521 = vadd.xlane.f32.xlu2 %v516_v32 }
 0x12e   : > { %v497_v33 = vpop.xlane.xlu1 %496 }
 0x12f   : > { %v509_v34 = vmul.f32 %v1420_v23, %v497_v33 }
 0x131   : > { %v1433_v35 = vsub.f32 %v487_v14, %v509_v34  ;;  %v667_v14 = vld [vmem:[#allocation5 + $0x78] sm:$0xff]  ;;  %v662_v34 = vld [vmem:[#allocation5 + $0x50] sm:$0xff] }
 0x132   : > { %672 = vmatpush.msra.mxu2 %v667_v14 }
 0x133   : > { %v517_v36 = vmul.f32 %v1433_v35, %v1433_v35 }
 0x134   : > { %673 = vmatpush.msra.mxu2 %v666_v15  ;;  %v713_v15 = vld [vmem:[#allocation7 + $0x40] sm:$0xff] }
 0x135   : > { %523 = vadd.xlane.f32.xlu0 %v517_v36 }
 0x136   : > { %v499_v37 = vpop.xlane.xlu1 %498  ;;  %674 = vmatpush.msra.mxu2 %v665_v20 }
 0x137   : > { %v510_v38 = vmul.f32 %v1420_v23, %v499_v37 }
 0x138   : > { %675 = vmatpush.msra.mxu2 %v664_v26 }
 0x139   : > { %v1438_v39 = vsub.f32 %v490_v16, %v510_v38  ;;  %v661_v38 = vld [vmem:[#allocation5 + $0x48] sm:$0xff] }
 0x13a   : > { %676 = vmatpush.msra.mxu2 %v663_v30  ;;  %v706_v30 = vld [vmem:[#allocation7 + $0x8] sm:$0xff] }
 0x13b   : > { %v518_v40 = vmul.f32 %v1438_v39, %v1438_v39 }
 0x13c   : > { %677 = vmatpush.msra.mxu2 %v662_v34 }
 0x13d   : > { %525 = vadd.xlane.f32.xlu1 %v518_v40 }
 0x13e   : > { %678 = vmatpush.msra.mxu2 %v661_v38 }
 0x140   : > { %679 = vmatpush.msra.mxu2 %v660_v43 }
 0x198   : > { %v520_v56 = vpop.xlane.xlu2 %519 }
 0x199   : > { %v527_v57 = vmul.f32 %v520_v56, %v1420_v23  ;;  %v656_v56 = vld [vmem:[#allocation5 + $0x20] sm:$0xff] }
 0x19b   : > { %v531_v58 = vadd.f32 1e-05, %v527_v57 }
 0x19d   : > { %1061 = vrsqrt.f32 %v531_v58  ;;  %vm541_vm3 = vweird.f32 %v531_v58 }
 0x1a0   : > { %v522_v59 = vpop.xlane.xlu2 %521 }
 0x1a1   : > { %v528_v60 = vmul.f32 %v522_v59, %v1420_v23  ;;  %v655_v59 = vld [vmem:[#allocation5 + $0x18] sm:$0xff] }
 0x1a3   : > { %v1062_v61 = vpop.eup %1061  ;;  %v532_v62 = vadd.f32 1e-05, %v528_v60 }
 0x1a4   : > { %v536_v63 = vmul.f32 %v1062_v61, %v531_v58  ;;  %vm542_vm2 = vweird.f32 %v1062_v61 }
 0x1a5   : > { %1063 = vrsqrt.f32 %v532_v62  ;;  %vm543_vm4 = vmor %vm541_vm3, %vm542_vm2  ;;  %vm551_vm6 = vweird.f32 %v532_v62 }
 0x1a6   : > { %v537_v0 = vmul.f32 %v1062_v61, %v536_v63 }
 0x1a8   : > { %v538_v1 = vmul.f32 0.5, %v537_v0  ;;  %v524_v2 = vpop.xlane.xlu0 %523  ;;  %v654_v0 = vld [vmem:[#allocation5 + $0x10] sm:$0xff] }
 0x1a9   : > { %v529_v3 = vmul.f32 %v524_v2, %v1420_v23  ;;  %v652_v2 = vld [vmem:[#allocation5] sm:$0xff] }
 0x1aa   : > { %v539_v4 = vsub.f32 1.5, %v538_v1  ;;  %v653_v1 = vld [vmem:[#allocation5 + $0x8] sm:$0xff] }
 0x1ab   : > { %v1064_v5 = vpop.eup %1063  ;;  %v533_v6 = vadd.f32 1e-05, %v529_v3  ;;  %v1056_v3 = vld [vmem:[%s1534_s6] ss:$0 sm:$0xff] }
 0x1ac   : > { %v540_v7 = vmul.f32 %v1062_v61, %v539_v4  ;;  %v546_v8 = vmul.f32 %v1064_v5, %v532_v62  ;;  %vm552_vm5 = vweird.f32 %v1064_v5  ;;  %v720_v4 = vld [vmem:[#allocation7 + $0x78] sm:$0xff] }
 0x1ad   : > { %1065 = vrsqrt.f32 %v533_v6  ;;  %vm553_vm7 = vmor %vm551_vm6, %vm552_vm5  ;;  %vm561_vm9 = vweird.f32 %v533_v6  ;;  %725 = vmatpush.msra.mxu3 %v720_v4 }
 0x1ae   : > { %v547_v10 = vmul.f32 %v1064_v5, %v546_v8  ;;  %v544_v11 = vsel %vm543_vm4, %v1062_v61, %v540_v7  ;;  %v717_v8 = vld [vmem:[#allocation7 + $0x60] sm:$0xff] }
 0x1af   : > { %v575_v12 = vmul.f32 %v544_v11, %v1423_v27  ;;  %v715_v11 = vld [vmem:[#allocation7 + $0x50] sm:$0xff] }
 0x1b0   : > { %v548_v16 = vmul.f32 0.5, %v547_v10  ;;  %v526_v17 = vpop.xlane.xlu1 %525  ;;  %v716_v10 = vld [vmem:[#allocation7 + $0x58] sm:$0xff] }
 0x1b1   : > { %v530_v18 = vmul.f32 %v526_v17, %v1420_v23  ;;  %v583_v19 = vmul.f32 %v1448_v9, %v575_v12  ;;  %v714_v12 = vld [vmem:[#allocation7 + $0x48] sm:$0xff]  ;;  %v712_v17 = vld [vmem:[#allocation7 + $0x38] sm:$0xff] }
 0x1b2   : > { %v549_v21 = vsub.f32 1.5, %v548_v16 }
 0x1b3   : > { %v1066_v22 = vpop.eup %1065  ;;  %v534_v24 = vadd.f32 1e-05, %v530_v18  ;;  %v591_v25 = vadd.f32 %v1454_v13, %v583_v19  ;;  %v711_v18 = vld [vmem:[#allocation7 + $0x30] sm:$0xff]  ;;  %v710_v19 = vld [vmem:[#allocation7 + $0x28] sm:$0xff] }
 0x1b4   : > { %v550_v27 = vmul.f32 %v1064_v5, %v549_v21  ;;  %v556_v28 = vmul.f32 %v1066_v22, %v533_v6  ;;  %vm562_vm8 = vweird.f32 %v1066_v22 }
 0x1b5   : > { %1067 = vrsqrt.f32 %v534_v24  ;;  %v595_v29 = vmax.f32 %v591_v25, 0.0  ;;  %vm563_vm10 = vmor %vm561_vm9, %vm562_vm8  ;;  %vm571_vm12 = vweird.f32 %v534_v24  ;;  %v708_v25 = vld [vmem:[#allocation7 + $0x18] sm:$0xff] }
 0x1b6   : > { %v557_v23 = vmul.f32 %v1066_v22, %v556_v28  ;;  %v554_v32 = vsel %vm553_vm7, %v1064_v5, %v550_v27  ;;  %v719_v5 = vld [vmem:[#allocation7 + $0x70] sm:$0xff] }
 0x1b7   : > { %635 = vmatmul.f32.vlgmr.msra.gmra.mxu1 %v595_v29  ;;  %v576_v33 = vmul.f32 %v554_v32, %v1428_v31  ;;  %v659_v31 = vld [vmem:[#allocation5 + $0x38] sm:$0xff]  ;;  %726 = vmatpush.msra.mxu3 %v719_v5  ;;  %v707_v29 = vld [vmem:[#allocation7 + $0x10] sm:$0xff]  ;;  %v1057_v32 = vld [vmem:[%s1536_s8] ss:$0 sm:$0xff] }
 0x1b8   : > { %v558_v36 = vmul.f32 0.5, %v557_v23  ;;  %680 = vmatpush.msra.mxu2 %v659_v31  ;;  %v705_v23 = vld [vmem:[#allocation7] sm:$0xff] }
 0x1b9   : > { %v584_v37 = vmul.f32 %v1448_v9, %v576_v33  ;;  %v1058_v31 = vld [vmem:[%s1538_s10] ss:$0 sm:$0xff] }
 0x1ba   : > { %v559_v40 = vsub.f32 1.5, %v558_v36  ;;  %681 = vmatpush.msra.mxu2 %v658_v50 }
 0x1bb   : > { %v1068_v41 = vpop.eup %1067  ;;  %v592_v42 = vadd.f32 %v1454_v13, %v584_v37 }
 0x1bc   : > { %v560_v44 = vmul.f32 %v1066_v22, %v559_v40  ;;  %v566_v45 = vmul.f32 %v1068_v41, %v534_v24  ;;  %vm572_vm11 = vweird.f32 %v1068_v41  ;;  %682 = vmatpush.msra.mxu2 %v657_v53 }
 0x1bd   : > { %v596_v46 = vmax.f32 %v592_v42, 0.0  ;;  %vm573_vm13 = vmor %vm571_vm12, %vm572_vm11 }
 0x1be   : > { %v567_v47 = vmul.f32 %v1068_v41, %v566_v45  ;;  %v564_v48 = vsel %vm563_vm10, %v1066_v22, %v560_v44  ;;  %683 = vmatpush.msra.mxu2 %v656_v56  ;;  %v709_v22 = vld [vmem:[#allocation7 + $0x20] sm:$0xff] }
 0x1bf   : > { %638 = vmatmul.f32.gmra.mxu1 %v596_v46  ;;  %v577_v49 = vmul.f32 %v564_v48, %v1433_v35 }
 0x1c0   : > { %v568_v51 = vmul.f32 0.5, %v567_v47  ;;  %684 = vmatpush.msra.mxu2 %v655_v59 }
 0x1c1   : > { %v585_v52 = vmul.f32 %v1448_v9, %v577_v49 }
 0x1c2   : > { %v569_v54 = vsub.f32 1.5, %v568_v51  ;;  %685 = vmatpush.msra.mxu2 %v654_v0 }
 0x1c3   : > { %v593_v55 = vadd.f32 %v1454_v13, %v585_v52 }
 0x1c4   : > { %v570_v57 = vmul.f32 %v1068_v41, %v569_v54  ;;  %686 = vmatpush.msra.mxu2 %v653_v1 }
 0x1c5   : > { %v597_v58 = vmax.f32 %v593_v55, 0.0 }
 0x1c6   : > { %v574_v60 = vsel %vm573_vm13, %v1068_v41, %v570_v57  ;;  %687 = vmatpush.msra.mxu2 %v652_v2 }
 0x1c7   : > { %641 = vmatmul.f32.gmra.mxu1 %v597_v58  ;;  %v578_v35 = vmul.f32 %v574_v60, %v1438_v39  ;;  %v718_v39 = vld [vmem:[#allocation7 + $0x68] sm:$0xff] }
 0x1c8   : > { %727 = vmatpush.msra.mxu3 %v718_v39 }
 0x1c9   : > { %v586_v61 = vmul.f32 %v1448_v9, %v578_v35 }
 0x1ca   : > { %728 = vmatpush.msra.mxu3 %v717_v8 }
 0x1cb   : > { %v594_v62 = vadd.f32 %v1454_v13, %v586_v61 }
 0x1cc   : > { %729 = vmatpush.msra.mxu3 %v716_v10 }
 0x1cd   : > { %v598_v63 = vmax.f32 %v594_v62, 0.0 }
 0x1ce   : > { %730 = vmatpush.msra.mxu3 %v715_v11 }
 0x1cf   : > { %644 = vmatmul.f32.gmra.mxu1 %v598_v63 }
 0x1d0   : > { %731 = vmatpush.msra.mxu3 %v714_v12 }
 0x1d2   : > { %732 = vmatpush.msra.mxu3 %v713_v15 }
 0x1d4   : > { %733 = vmatpush.msra.mxu3 %v712_v17 }
 0x1d6   : > { %734 = vmatpush.msra.mxu3 %v711_v18 }
 0x1d8   : > { %735 = vmatpush.msra.mxu3 %v710_v19 }
 0x1da   : > { %736 = vmatpush.msra.mxu3 %v709_v22 }
 0x1dc   : > { %737 = vmatpush.msra.mxu3 %v708_v25 }
 0x1de   : > { %738 = vmatpush.msra.mxu3 %v707_v29 }
 0x1e0   : > { %739 = vmatpush.msra.mxu3 %v706_v30 }
 0x1e2   : > { %740 = vmatpush.msra.mxu3 %v705_v23 }
 0x234   : > { %v636_v6 = vpop.f32.mrf.mxu1 }
 0x235   : > { %v637_v7 = vadd.f32 %v1056_v3, %v636_v6 }
 0x237   : > { %v648_v9 = vmax.f32 %v637_v7, 0.0 }
 0x239   : > { %688 = vmatmul.f32.vlgmr.msra.gmra.mxu2 %v648_v9 }
 0x23c   : > { %v639_v13 = vpop.f32.mrf.mxu1 }
 0x23d   : > { %v640_v14 = vadd.f32 %v1056_v3, %v639_v13 }
 0x23f   : > { %v649_v16 = vmax.f32 %v640_v14, 0.0 }
 0x241   : > { %691 = vmatmul.f32.gmra.mxu2 %v649_v16 }
 0x244   : > { %v642_v20 = vpop.f32.mrf.mxu1 }
 0x245   : > { %v643_v21 = vadd.f32 %v1056_v3, %v642_v20 }
 0x247   : > { %v650_v24 = vmax.f32 %v643_v21, 0.0 }
 0x249   : > { %694 = vmatmul.f32.gmra.mxu2 %v650_v24 }
 0x24c   : > { %v645_v26 = vpop.f32.mrf.mxu1 }
 0x24d   : > { %v646_v27 = vadd.f32 %v1056_v3, %v645_v26 }
 0x24f   : > { %v651_v28 = vmax.f32 %v646_v27, 0.0 }
 0x251   : > { %697 = vmatmul.f32.gmra.mxu2 %v651_v28 }
 0x2bc   : > { %v689_v33 = vpop.f32.mrf.mxu2 }
 0x2bd   : > { %v690_v34 = vadd.f32 %v1057_v32, %v689_v33 }
 0x2bf   : > { %v701_v36 = vmax.f32 %v690_v34, 0.0 }
 0x2c1   : > { %741 = vmatmul.f32.vlgmr.msra.gmra.mxu3 %v701_v36 }
 0x2c4   : > { %v692_v37 = vpop.f32.mrf.mxu2 }
 0x2c5   : > { %v693_v38 = vadd.f32 %v1057_v32, %v692_v37 }
 0x2c7   : > { %v702_v40 = vmax.f32 %v693_v38, 0.0 }
 0x2c9   : > { %744 = vmatmul.f32.gmra.mxu3 %v702_v40 }
 0x2cc   : > { %v695_v41 = vpop.f32.mrf.mxu2 }
 0x2cd   : > { %v696_v42 = vadd.f32 %v1057_v32, %v695_v41 }
 0x2cf   : > { %v703_v43 = vmax.f32 %v696_v42, 0.0 }
 0x2d1   : > { %747 = vmatmul.f32.gmra.mxu3 %v703_v43 }
 0x2d4   : > { %v698_v44 = vpop.f32.mrf.mxu2 }
 0x2d5   : > { %v699_v45 = vadd.f32 %v1057_v32, %v698_v44 }
 0x2d7   : > { %v704_v46 = vmax.f32 %v699_v45, 0.0 }
 0x2d9   : > { %750 = vmatmul.f32.gmra.mxu3 %v704_v46 }
 0x344   : > { %v742_v47 = vpop.f32.mrf.mxu3 }
 0x345   : > { %v743_v48 = vadd.f32 %v1058_v31, %v742_v47 }
 0x347   : > { %754 = vmax.xlane.f32.xlu2 %v743_v48 }
 0x34c   : > { %v745_v49 = vpop.f32.mrf.mxu3 }
 0x34d   : > { %v746_v50 = vadd.f32 %v1058_v31, %v745_v49 }
 0x34f   : > { %756 = vmax.xlane.f32.xlu0 %v746_v50 }
 0x354   : > { %v748_v51 = vpop.f32.mrf.mxu3 }
 0x355   : > { %v749_v52 = vadd.f32 %v1058_v31, %v748_v51 }
 0x357   : > { %758 = vmax.xlane.f32.xlu1 %v749_v52 }
 0x35c   : > { %v751_v53 = vpop.f32.mrf.mxu3 }
 0x35d   : > { %v752_v54 = vadd.f32 %v1058_v31, %v751_v53 }
 0x35f   : > { %760 = vmax.xlane.f32.xlu2 %v752_v54 }
 0x3ba   : > { %v755_v55 = vpop.xlane.xlu2 %754 }
 0x3bb   : > { %v762_v56 = vsub.f32 %v743_v48, %v755_v55 }
 0x3bd   : > { %v766_v57 = vmul.f32 1.442695, %v762_v56 }
 0x3bf   : > { %1069 = vpow2.f32 %v766_v57 }
 0x3c2   : > { %v757_v58 = vpop.xlane.xlu0 %756 }
 0x3c3   : > { %v763_v59 = vsub.f32 %v746_v50, %v757_v58 }
 0x3c5   : > { %v1070_v60 = vpop.eup %1069  ;;  %v768_v35 = vmul.f32 1.442695, %v763_v59 }
 0x3c6   : > { %774 = vadd.xlane.f32.xlu0 %v1070_v60 }
 0x3c7   : > { %1071 = vpow2.f32 %v768_v35 }
 0x3ca   : > { %v759_v61 = vpop.xlane.xlu1 %758 }
 0x3cb   : > { %v764_v62 = vsub.f32 %v749_v52, %v759_v61 }
 0x3cd   : > { %v1072_v63 = vpop.eup %1071  ;;  %v770_v0 = vmul.f32 1.442695, %v764_v62 }
 0x3ce   : > { %776 = vadd.xlane.f32.xlu1 %v1072_v63 }
 0x3cf   : > { %1073 = vpow2.f32 %v770_v0 }
 0x3d2   : > { %v761_v1 = vpop.xlane.xlu2 %760 }
 0x3d3   : > { %v765_v2 = vsub.f32 %v752_v54, %v761_v1 }
 0x3d5   : > { %v1477_v3 = vpop.eup %1073  ;;  %v772_v4 = vmul.f32 1.442695, %v765_v2 }
 0x3d6   : > { %778 = vadd.xlane.f32.xlu2 %v1477_v3 }
 0x3d7   : > { %1075 = vpow2.f32 %v772_v4 }
 0x3dd   : > { %v1480_v5 = vpop.eup %1075 }
 0x3de   : > { %780 = vadd.xlane.f32.xlu0 %v1480_v5 }
 0x439   : > { %v775_v39 = vpop.xlane.xlu0 %774 }
 0x43a   : > { %1077 = vrcp.f32 %v775_v39  ;;  %v793_v10 = vand.u32 2147483648, %v775_v39  ;;  %v791_v12 = vand.u32 2147483647, %v775_v39  ;;  %vm787_vm15 = vweird.f32 %v775_v39 }
 0x43c   : > { %v794_v15 = vor.u32 1.1754944e-38, %v793_v10  ;;  %vm792_vm1 = vcmp.eq.f32.partialorder %v791_v12, 8.507059e+37 }
 0x440   : > { %v1078_v6 = vpop.eup %1077 }
 0x441   : > { %v783_v7 = vmul.f32 %v1078_v6, %v775_v39  ;;  %v777_v8 = vpop.xlane.xlu1 %776  ;;  %vm788_vm14 = vweird.f32 %v1078_v6 }
 0x442   : > { %1079 = vrcp.f32 %v777_v8  ;;  %vm789_vm0 = vmor %vm787_vm15, %vm788_vm14  ;;  %v808_v22 = vand.u32 2147483648, %v777_v8  ;;  %v806_v25 = vand.u32 2147483647, %v777_v8  ;;  %vm802_vm3 = vweird.f32 %v777_v8 }
 0x443   : > { %v784_v9 = vsub.f32 1.0, %v783_v7 }
 0x444   : > { %v809_v28 = vor.u32 1.1754944e-38, %v808_v22  ;;  %vm807_vm5 = vcmp.eq.f32.partialorder %v806_v25, 8.507059e+37 }
 0x445   : > { %v785_v11 = vmul.f32 %v1078_v6, %v784_v9 }
 0x447   : > { %v786_v13 = vadd.f32 %v1078_v6, %v785_v11 }
 0x448   : > { %v1080_v14 = vpop.eup %1079 }
 0x449   : > { %v790_v16 = vsel %vm789_vm0, %v1078_v6, %v786_v13  ;;  %v798_v17 = vmul.f32 %v1080_v14, %v777_v8  ;;  %v779_v18 = vpop.xlane.xlu2 %778  ;;  %vm803_vm2 = vweird.f32 %v1080_v14 }
 0x44a   : > { %v795_v19 = vsel %vm792_vm1, %v794_v15, %v790_v16  ;;  %1081 = vrcp.f32 %v779_v18  ;;  %vm804_vm4 = vmor %vm802_vm3, %vm803_vm2  ;;  %v823_v36 = vand.u32 2147483648, %v779_v18  ;;  %v821_v38 = vand.u32 2147483647, %v779_v18 }
 0x44b   : > { %v796_v20 = vmul.f32 %v1070_v60, %v795_v19  ;;  %v799_v21 = vsub.f32 1.0, %v798_v17  ;;  %vm817_vm7 = vweird.f32 %v779_v18 }
 0x44c   : > { %v824_v42 = vor.u32 1.1754944e-38, %v823_v36  ;;  %vm822_vm9 = vcmp.eq.f32.partialorder %v821_v38, 8.507059e+37 }
 0x44d   : > { %842 = vst [vmem:[%s1486_s12] sm:$0xff] %v796_v20  ;;  %v800_v24 = vmul.f32 %v1080_v14, %v799_v21 }
 0x44f   : > { %v801_v26 = vadd.f32 %v1080_v14, %v800_v24 }
 0x450   : > { %v1082_v27 = vpop.eup %1081 }
 0x451   : > { %v805_v29 = vsel %vm804_vm4, %v1080_v14, %v801_v26  ;;  %v813_v30 = vmul.f32 %v1082_v27, %v779_v18  ;;  %v781_v23 = vpop.xlane.xlu0 %780  ;;  %vm818_vm6 = vweird.f32 %v1082_v27 }
 0x452   : > { %v810_v32 = vsel %vm807_vm5, %v809_v28, %v805_v29  ;;  %1083 = vrcp.f32 %v781_v23  ;;  %vm819_vm8 = vmor %vm817_vm7, %vm818_vm6  ;;  %v838_v47 = vand.u32 2147483648, %v781_v23  ;;  %v836_v49 = vand.u32 2147483647, %v781_v23 }
 0x453   : > { %v811_v33 = vmul.f32 %v1072_v63, %v810_v32  ;;  %v814_v34 = vsub.f32 1.0, %v813_v30  ;;  %vm832_vm11 = vweird.f32 %v781_v23 }
 0x454   : > { %v839_v51 = vor.u32 1.1754944e-38, %v838_v47  ;;  %vm837_vm13 = vcmp.eq.f32.partialorder %v836_v49, 8.507059e+37 }
 0x455   : > { %843 = vst [vmem:[%s1486_s12 + $0x8] sm:$0xff] %v811_v33  ;;  %v815_v37 = vmul.f32 %v1082_v27, %v814_v34 }
 0x457   : > { %v816_v40 = vadd.f32 %v1082_v27, %v815_v37 }
 0x458   : > { %v1084_v41 = vpop.eup %1083 }
 0x459   : > { %v820_v43 = vsel %vm819_vm8, %v1082_v27, %v816_v40  ;;  %v828_v44 = vmul.f32 %v1084_v41, %v781_v23  ;;  %vm833_vm10 = vweird.f32 %v1084_v41 }
 0x45a   : > { %v825_v45 = vsel %vm822_vm9, %v824_v42, %v820_v43  ;;  %vm834_vm12 = vmor %vm832_vm11, %vm833_vm10 }
 0x45b   : > { %v826_v46 = vmul.f32 %v1477_v3, %v825_v45  ;;  %v829_v31 = vsub.f32 1.0, %v828_v44 }
 0x45d   : > { %844 = vst [vmem:[%s1486_s12 + $0x10] sm:$0xff] %v826_v46  ;;  %v830_v48 = vmul.f32 %v1084_v41, %v829_v31 }
 0x45f   : > { %v831_v50 = vadd.f32 %v1084_v41, %v830_v48 }
 0x461   : > { %v835_v52 = vsel %vm834_vm12, %v1084_v41, %v831_v50 }
 0x462   : > { %v840_v53 = vsel %vm837_vm13, %v839_v51, %v835_v52 }
 0x463   : > { %v841_v54 = vmul.f32 %v1480_v5, %v840_v53 }
 0x465   : > { %845 = vst [vmem:[%s1486_s12 + $0x18] sm:$0xff] %v841_v54 }
 0x466   : > { %1202 = shalt.err (!%p1199_p8)
}
 0x467   : > { %s1253_s25 = smov 128   ;;  %s1254_s12 = smov 8  }
 0x468   : > { %990 = dma.vmem_to_hbm [thread:$0]  (%p1353_p5), %s860_s19, 512, %s862_s21, %s847_s23, %s1253_s25, %s1253_s25, %s1254_s12  }
 0x469 PF: > { %p1012_p9 = scmp.ge.s32.totalorder %s1245_s20, 2  ;;  %s876_s14 = sand.u32 1, %s1233_s17  }
 0x46a   : > { %s877_s15 = scalar_lea.sflag [#allocation4], %s876_s14 }
 0x46b   : > { %p1003_p10 = pnand %p1012_p9, %p1357_p6 }
 0x46d   : > { %p1004_p11 = pneg %p1003_p10 }
 0x46f   : > { %1228 = dma.done.wait (%p1004_p11), %s877_s15, 512  }
 0x470   : > { %1230 = vsyncadd (%p1004_p11), %s877_s15, 4294966784  ;;  %s1554_s20 = sld [smem:[#allocation13_spill]]  ;;  %s1557_s17 = smov %s1237_s18 }
 0x471   : > { %s1555_s7 = sld [smem:[#allocation12_spill]] }
 0x472   : > { %s1556_s19 = sld [smem:[#allocation14_spill]] }
 0x476   : > { %p23_p12 = scmp.ge.s32.totalorder %s1554_s20, 4  }
 0x477   : > { %s1558_s18 = smov %s1555_s7 }
 0x478   :  { %25 = sbr.rel (!%p23_p12) target bundleno = 8 (0x8), region = 112 }
 0x47d   :  { %883 = vsyncpa [#allocation3], 1 }
 0x47e   :  { %885 = vsyncpa [#allocation3 + $0x1], 1 }
 0x47f   :  { %886 = vsyncpa [#allocation6], 1 }
 0x480   :  { %887 = vsyncpa [#allocation4], 1 }
 0x481   :  { %889 = vsyncpa [#allocation4 + $0x1], 1 }

</bundles_post_ra>
